<compile_context>
chip_gen: v5e
topology: v5e:2x2
jax: 0.10.0
libtpu: 0.0.40
codegen_flags: <defaults>
</compile_context>

<pallas_src>
import functools

import jax
import jax.numpy as jnp
from jax.experimental import pallas as pl
from jax.experimental.pallas import tpu as pltpu


def _kv_update_kernel(align, offset_ref, c_kv_ref, cache_hbm_ref, out_hbm_ref, sem):
    """Write the (B, T, D) chunk into the aliased cache at a dynamic offset.

    align        : static int, compile-time guarantee that offset % align == 0
    offset_ref   : SMEM scalar-prefetch ref, shape (1,), int32
    c_kv_ref     : VMEM (B, T, D)  new chunk
    cache_hbm_ref: HBM  (B, S, D)  aliased to out_hbm_ref -- never read
    out_hbm_ref  : HBM  (B, S, D)  cache, updated in place
    sem          : DMA semaphore
    """
    del cache_hbm_ref  # Aliased to out_hbm_ref; chunk-only update needs no cache read.
    t = c_kv_ref.shape[1]
    off = offset_ref[0]
    if align > 1:
        off = pl.multiple_of(off, align)  # unlock aligned (non-RMW) sublane writes
    cp = pltpu.make_async_copy(
        c_kv_ref,                                   # (B, T, D) in VMEM
        out_hbm_ref.at[:, pl.ds(off, t), :],        # (B, T, D) window of the cache
        sem,
    )
    cp.start()
    cp.wait()


@functools.partial(jax.jit, static_argnums=(3,), donate_argnums=(0,))
def _kv_cache_update(cache, c_kv, offset_arr, align):
    B, S, D = cache.shape
    _, T, _ = c_kv.shape

    grid_spec = pltpu.PrefetchScalarGridSpec(
        num_scalar_prefetch=1,
        grid=(1,),
        in_specs=[
            # Only the chunk is auto-DMA'd into VMEM.
            pl.BlockSpec((B, T, D), lambda i, off_ref: (0, 0, 0)),
            # Cache stays in HBM; no automatic DMA, no VMEM block.
            pl.BlockSpec(memory_space=pl.ANY),
        ],
        out_specs=pl.BlockSpec(memory_space=pl.ANY),
        scratch_shapes=[pltpu.SemaphoreType.DMA(())],
    )

    return pl.pallas_call(
        functools.partial(_kv_update_kernel, align),
        out_shape=jax.ShapeDtypeStruct((B, S, D), c_kv.dtype),
        grid_spec=grid_spec,
        # Inputs are (offset_arr, c_kv, cache) -> cache (idx 2, counting the
        # scalar-prefetch arg) aliases output 0: the update is in place.
        input_output_aliases={2: 0},
        compiler_params=pltpu.CompilerParams(
            dimension_semantics=("arbitrary",),
        ),
    )(offset_arr, c_kv, cache)


def kv_cache_update(cache: jax.Array, c_kv: jax.Array, offset: int) -> jax.Array:
    """Returns the cache with c_kv written at [:, offset:offset+T, :] (in place)."""
    B, S, D = cache.shape
    Bc, T, Dc = c_kv.shape
    assert Bc == B and Dc == D
    assert 0 <= offset and offset + T <= S, "KV Cache Exceeded"
    assert cache.dtype == c_kv.dtype, "cast the cache once at allocation, not per step"

    # offset is a Python int here, so the alignment guarantee is static:
    # at most two compiled variants (aligned / unaligned).
    align = 8 if offset % 8 == 0 else 1
    offset_arr = jnp.array([offset], dtype=jnp.int32)
    return _kv_cache_update(cache, c_kv, offset_arr, align)


class KVCache:
    """Functional JAX/Pallas equivalent of the PyTorch KVCache module.

    `data` is a jnp buffer updated in place (Pallas aliasing + jit donation);
    `offset` is a Python int, exactly as in the PyTorch module.
    """

    def __init__(self, kv_cache_shape: tuple, dtype=jnp.float32) -> None:
        self._shape = tuple(kv_cache_shape)
        self._dtype = dtype
        self.zero()

    def zero(self) -> None:
        self.offset = 0
        self.data = jnp.zeros(self._shape, dtype=self._dtype)

    def __call__(self, c_kv: jax.Array) -> jax.Array:
        T = c_kv.shape[1]
        assert self.offset + T <= self.data.shape[1], "KV Cache Exceeded"
        # Match PyTorch semantics (cache follows incoming dtype).  Allocate the
        # cache in the target dtype up-front so this branch is a no-op on the
        # hot path — an actual dtype change costs a full cache-sized copy.
        if self.data.dtype != c_kv.dtype:
            self.data = self.data.astype(c_kv.dtype)
        self.data = kv_cache_update(self.data, c_kv, self.offset)
        self.offset += T
        # offset is a Python int, so this is a static-prefix view.
        return self.data[:, : self.offset]


if __name__ == "__main__":
    # Small deterministic example: cache (B, S_max, D) = (2, 64, 128),
    # two chunks of T = 8 tokens.  D = 128 keeps the store lane-dense,
    # T = 8 keeps offsets sublane-aligned.
    B, S_MAX, D, T = 2, 64, 128, 8
    key = jax.random.PRNGKey(0)
    k1, k2 = jax.random.split(key)
    c_kv_0 = jax.random.normal(k1, (B, T, D), dtype=jnp.float32)
    c_kv_1 = jax.random.normal(k2, (B, T, D), dtype=jnp.float32)

    cache = KVCache((B, S_MAX, D))
    out0 = cache(c_kv_0)
    out1 = cache(c_kv_1)
    jax.block_until_ready(out1)

    # Pure-JAX reference.
    ref = jnp.zeros((B, S_MAX, D), dtype=jnp.float32)
    ref = jax.lax.dynamic_update_slice(ref, c_kv_0, (0, 0, 0))
    ref0 = ref[:, :T]
    ref = jax.lax.dynamic_update_slice(ref, c_kv_1, (0, T, 0))
    ref1 = ref[:, : 2 * T]

    assert out0.shape == (B, T, D)
    assert out1.shape == (B, 2 * T, D)
    assert jnp.allclose(out0, ref0), "mismatch after first update"
    assert jnp.allclose(out1, ref1), "mismatch after second update"
    # Untouched tail of the cache must still be zero (aliased carry-through).
    assert jnp.allclose(cache.data[:, 2 * T :], 0.0), "cache tail corrupted"

    print("KERNEL_OK")
</pallas_src>

<mosaic_0001>
module attributes {stable_mosaic.version = 11 : i64} {
  func.func @_kv_update_kernel(%arg0: i32, %arg1: memref<1xi32, #tpu.memory_space<smem>>, %arg2: memref<2x8x128xf32, #tpu.memory_space<vmem>>, %arg3: memref<2x64x128xf32, #tpu.memory_space<any>>, %arg4: memref<2x64x128xf32, #tpu.memory_space<any>>, %arg5: memref<!tpu.dma_semaphore, #tpu.memory_space<semaphore_mem>>) attributes {dimension_semantics = [#tpu.dimension_semantics<arbitrary>], iteration_bounds = array<i64: 1>, scalar_prefetch = 1 : i64, scratch_operands = 1 : i64, tpu.core_type = #tpu.core_type<tc>, window_params = [{pipeline_mode = #tpu.pipeline_mode<synchronous>, transform_indices = @transform_0, window_bounds = array<i64: 2, 8, 128>}, {}, {}]} {
    %c0 = arith.constant 0 : index
    %0 = memref.load %arg1[%c0] : memref<1xi32, #tpu.memory_space<smem>>
    %1 = tpu.assume_multiple %0, 8 : i32
    %c0_i32 = arith.constant 0 : i32
    %c0_i32_0 = arith.constant 0 : i32
    %2 = tpu.memref_slice %arg4[%c0_i32, %1, %c0_i32_0] : memref<2x64x128xf32, #tpu.memory_space<any>> -> memref<2x8x128xf32, #tpu.memory_space<any>>
    tpu.enqueue_dma source(%arg2 : memref<2x8x128xf32, #tpu.memory_space<vmem>>) target(%2 : memref<2x8x128xf32, #tpu.memory_space<any>>) target_semaphore(%arg5 : memref<!tpu.dma_semaphore, #tpu.memory_space<semaphore_mem>>)
    %c0_i32_1 = arith.constant 0 : i32
    %c0_i32_2 = arith.constant 0 : i32
    %3 = tpu.memref_slice %arg4[%c0_i32_1, %1, %c0_i32_2] : memref<2x64x128xf32, #tpu.memory_space<any>> -> memref<2x8x128xf32, #tpu.memory_space<any>>
    tpu.wait_dma2 semaphore(%arg5 : memref<!tpu.dma_semaphore, #tpu.memory_space<semaphore_mem>>) src(%arg2 : memref<2x8x128xf32, #tpu.memory_space<vmem>>) dst(%3 : memref<2x8x128xf32, #tpu.memory_space<any>>)
    return
  }
  func.func @transform_0(%arg0: i32, %arg1: memref<1xi32, #tpu.memory_space<smem>>) -> (i32, i32, i32) {
    %c0_i32 = arith.constant 0 : i32
    %c0_i32_0 = arith.constant 0 : i32
    %c0_i32_1 = arith.constant 0 : i32
    %c0_i32_2 = arith.constant 0 : i32
    return %c0_i32, %c0_i32_0, %c0_i32_1 : i32, i32, i32
  }
}

</mosaic_0001>

<bundles_post_ra>
// kernel: _kv_cache_update.1
= control target key start
LH: loop header
LB: loop body
LE: loop exit
PB: predicated region body
PF: predicated region fallthrough
CT: control target
= control target key end

     0   :  { %9 = vsyncpa [#allocation6], 0  ;;  %s106_s15 = smov [#allocation5]   ;;  %s107_s17 = smov 128   ;;  %s145_s0 = inlined_call_operand.<no memory space> [shape: s32[1], index: 0, kind: input, shape index: {}]   ;;  %s146_s1 = inlined_call_operand.hbm [shape: f32[2,8,128], index: 1, kind: input, shape index: {}]   ;;  %s147_s2 = inlined_call_operand.hbm [shape: f32[2,64,128], index: 2, kind: input, shape index: {}, may-alias: {2,3}]   ;;  %s148_s3 = inlined_call_operand.hbm [shape: f32[2,64,128], index: 3, kind: output, shape index: {}, may-alias: {2,3}]  }
   0x1   :  { %s14_s14 = sshll.u32 %s146_s1, 4  ;;  %s16_s16 = sshll.u32 %s106_s15, 4  ;;  %s15_s14 = int_to_ptr.hbm [resolvable:$true] %s14_s14  ;;  %s17_s16 = int_to_ptr.vmem [resolvable:$true] %s16_s16 }
   0x2   :  { %s108_s18 = smov 8  }
   0x3   :  { %22 = dma.hbm_to_vmem [thread:$0]  %s15_s14, 256, %s17_s16, [#allocation6], %s107_s17, %s107_s17, %s108_s18  }
   0x4   :  { %102 = dma.done.wait [#allocation6], 256  }
   0x5   :  { %103 = vsyncadd [#allocation6], 4294967040  ;;  %s28_s22 = scalar_lea.hbm %s148_s3, %s145_s0  ;;  %s94_s27 = scalar_lea.hbm %s148_s3, 128 }
   0x6   :  { %s31_s23 = sshll.u32 %s28_s22, 4  ;;  %s32_s23 = int_to_ptr.hbm [resolvable:$true] %s31_s23 }
   0x7   :  { %s90_s24 = sshra.s32 %s32_s23, 4  ;;  %s91_s24 = int_to_ptr.hbm [resolvable:$true] %s90_s24 }
   0x8   :  { %s92_s1 = scalar_lea.hbm %s91_s24, 16  ;;  %p95_p1 = scmp.lt.s32.totalorder %s91_s24, %s148_s3 }
   0x9   :  { %p93_p0 = scmp.ne.s32.totalorder %s91_s24, %s92_s1  ;;  %p96_p2 = scmp.lt.s32.totalorder %s94_s27, %s92_s1 }
   0xb   :  { %p97_p3 = por %p96_p2, %p95_p1 }
   0xd   :  { %p98_p4 = pnand %p97_p3, %p93_p0 }
   0xf   :  { %101 = shalt.err (!%p98_p4)  }
  0x10   :  { %s109_s30 = smov 1024  }
  0x11   :  { %36 = dma.vmem_to_hbm [thread:$0]  %s17_s16, 256, %s32_s23, [#allocation2], %s107_s17, %s109_s30, %s108_s18 }
  0x12   :  { %104 = dma.done.wait [#allocation2], 256 }
  0x13   :  { %105 = vsyncadd [#allocation2], 4294967040 }
  0x14   :  { %41 = vsyncpa [#allocation6], 1 }
  0x15   :  { %42 = vsyncmov [#allocation2] }
  0x18   :  { %s43_s0 = vpop.sfrf %42 }
  0x19   :  { %p49_p5 = scmp.ne.s32.totalorder %s43_s0, 0 }
  0x1b   :  { %47 = shalt.err (%p49_p5)  }

</bundles_post_ra>
